<compile_context>
chip_gen: v6e
topology: v6e:2x2x1
jax: 0.10.0
libtpu: 0.0.40
codegen_flags: <defaults>
</compile_context>

<pallas_src>
import functools

import jax
import jax.numpy as jnp
import numpy as np
from jax.experimental import pallas as pl
from jax.experimental.pallas import tpu as pltpu


def _round_up(x, m):
    return (x + m - 1) // m * m


# ----------------------------------------------------------------------------
# Pallas kernel: one (row-tile i, vocab-partition p) grid step
#   acc[i] (+)= onehot(ids_tile - p*Vp) @ W[p*Vp : (p+1)*Vp]
#   o[i]    = acc[i].astype(out_dtype)          (on the last partition step)
# ----------------------------------------------------------------------------
def _vpe_kernel(ids_ref, w_ref, o_ref, acc_ref, *, vocab_per_part):
    p = pl.program_id(1)
    n_parts = pl.num_programs(1)

    ids = ids_ref[...]                                       # (TM, 1) int32
    tm = ids.shape[0]

    # Fold the partition offset into the ids: a (TM,1) subtract instead of a
    # (TM, Vp) add on the iota.  Rows whose id falls outside this partition
    # (including padded ids == -1) match no column -> all-zero one-hot row,
    # exactly matching `masked_input[mask]=0; output_parallel[mask,:]=0.0`.
    local = ids - p * vocab_per_part                         # (TM, 1)
    col = jax.lax.broadcasted_iota(jnp.int32, (tm, vocab_per_part), 1)
    onehot = (local == col).astype(w_ref.dtype)              # (TM, Vp), 0/1 exact

    # Weight table is resident in VMEM for the whole kernel; slice shard p.
    start = pl.multiple_of(p * vocab_per_part, vocab_per_part)
    w_shard = w_ref[pl.ds(start, vocab_per_part), :]         # (Vp, D)

    partial = jnp.dot(onehot, w_shard, preferred_element_type=jnp.float32)

    # Skip the zero-init read-modify-write: write the first partial directly.
    @pl.when(p == 0)
    def _():
        acc_ref[...] = partial

    @pl.when(p != 0)
    def _():
        acc_ref[...] += partial

    # Cast + store once, in-kernel, to the output dtype (= weight dtype).
    @pl.when(p == n_parts - 1)
    def _():
        o_ref[...] = acc_ref[...].astype(o_ref.dtype)


# ----------------------------------------------------------------------------
# Wrapper: VocabParallelEmbedding forward
# ----------------------------------------------------------------------------
def vocab_parallel_embedding(input_ids, weight, world_size, *, tm=512):
    """weight: (num_embeddings, embedding_dim) master table; rank p owns rows
    [p*Vp, (p+1)*Vp). Returns embeddings of shape input_ids.shape + (D,)
    in the weight's dtype (cast happens inside the kernel)."""
    V, D = weight.shape
    assert V % world_size == 0, "vocab must divide world_size"
    Vp = V // world_size
    assert Vp % 8 == 0, "pad the vocabulary so each partition is a multiple of 8 rows"

    orig_shape = input_ids.shape
    ids = input_ids.reshape(-1).astype(jnp.int32)
    M = ids.shape[0]

    TM = min(tm, _round_up(M, 128))          # large, lane-dense row tiles
    Mp = _round_up(M, TM)
    ids = jnp.pad(ids, (0, Mp - M), constant_values=-1).reshape(Mp, 1)

    n_row_tiles = Mp // TM
    grid = (n_row_tiles, world_size)         # reduction (partition) axis last

    w_bytes = weight.dtype.itemsize
    # Explicit VMEM budget: resident table (x2 buffers worst case) + ids +
    # output blocks + f32 accumulator scratch + one-hot / shard temporaries.
    vmem_need = (2 * V * D * w_bytes + 2 * TM * 4 + 2 * TM * D * w_bytes
                 + TM * D * 4 + TM * Vp * w_bytes + Vp * D * w_bytes)
    vmem_limit = int(min(max(vmem_need * 3 // 2, 16 * 2**20), 64 * 2**20))

    kernel = functools.partial(_vpe_kernel, vocab_per_part=Vp)

    out = pl.pallas_call(
        kernel,
        out_shape=jax.ShapeDtypeStruct((Mp, D), weight.dtype),
        grid=grid,
        in_specs=[
            pl.BlockSpec((TM, 1), lambda i, p: (i, 0)),    # token ids
            pl.BlockSpec((V, D), lambda i, p: (0, 0)),     # resident weight table
        ],
        out_specs=pl.BlockSpec((TM, D), lambda i, p: (i, 0)),   # resident over p
        scratch_shapes=[pltpu.VMEM((TM, D), jnp.float32)],       # f32 accumulator
        compiler_params=pltpu.CompilerParams(
            dimension_semantics=("parallel", "arbitrary"),
            vmem_limit_bytes=vmem_limit),
        cost_estimate=pl.CostEstimate(
            flops=2 * Mp * V * D,
            transcendentals=0,
            bytes_accessed=4 * Mp + V * D * w_bytes + Mp * D * w_bytes),
    )(ids, weight)

    return out[:M].reshape(*orig_shape, D)


# ----------------------------------------------------------------------------
# Pure-JAX reference implementing the PyTorch semantics rank-by-rank
# ----------------------------------------------------------------------------
def vocab_parallel_embedding_ref(input_ids, weight, world_size):
    V, D = weight.shape
    Vp = V // world_size
    out = jnp.zeros(input_ids.shape + (D,), jnp.float32)
    for p in range(world_size):
        start, end = p * Vp, (p + 1) * Vp
        mask = (input_ids < start) | (input_ids >= end)
        masked = jnp.where(mask, 0, input_ids - start)
        part = jnp.take(weight[start:end], masked, axis=0)       # F.embedding
        part = jnp.where(mask[..., None], 0.0, part)             # zero masked rows
        out = out + part                                         # all-reduce sum
    return out.astype(weight.dtype)


if __name__ == "__main__":
    # VocabParallelEmbedding(num_embeddings=256, embedding_dim=128), world_size=2
    num_embeddings, embedding_dim = 256, 128
    world_size = 2
    batch, seq = 2, 64

    key = jax.random.PRNGKey(0)
    k_ids, k_w = jax.random.split(key)
    input_ids = jax.random.randint(k_ids, (batch, seq), 0, num_embeddings,
                                   dtype=jnp.int32)
    # xavier-normal-ish master weight (same table all "ranks" would build)
    weight = jax.random.normal(k_w, (num_embeddings, embedding_dim),
                               jnp.float32) * 0.05

    # float32 weights (module default)
    out = vocab_parallel_embedding(input_ids, weight, world_size)
    out = jax.block_until_ready(out)
    assert out.shape == (batch, seq, embedding_dim), out.shape
    ref = jax.block_until_ready(
        vocab_parallel_embedding_ref(input_ids, weight, world_size))
    err = float(jnp.max(jnp.abs(out.astype(jnp.float32) - ref.astype(jnp.float32))))
    if not np.isfinite(err) or err > 1e-6:
        raise AssertionError(
            f"Pallas VocabParallelEmbedding (f32) mismatch vs reference: max abs err = {err}")

    # bf16 weights (full-rate MXU path; one-hot row-select is bit-exact)
    weight_bf16 = weight.astype(jnp.bfloat16)
    out_bf = jax.block_until_ready(
        vocab_parallel_embedding(input_ids, weight_bf16, world_size))
    ref_bf = jax.block_until_ready(
        vocab_parallel_embedding_ref(input_ids, weight_bf16, world_size))
    err_bf = float(jnp.max(jnp.abs(out_bf.astype(jnp.float32) -
                                   ref_bf.astype(jnp.float32))))
    if not np.isfinite(err_bf) or err_bf > 1e-6:
        raise AssertionError(
            f"Pallas VocabParallelEmbedding (bf16) mismatch vs reference: max abs err = {err_bf}")

    print("KERNEL_OK")
</pallas_src>

<mosaic_0001>
module attributes {stable_mosaic.version = 11 : i64} {
  func.func @_vpe_kernel(%arg0: i32, %arg1: i32, %arg2: memref<128x1xi32, #tpu.memory_space<vmem>>, %arg3: memref<256x128xf32, #tpu.memory_space<vmem>>, %arg4: memref<128x128xf32, #tpu.memory_space<vmem>>, %arg5: memref<128x128xf32, #tpu.memory_space<vmem>>) attributes {dimension_semantics = [#tpu.dimension_semantics<parallel>, #tpu.dimension_semantics<arbitrary>], iteration_bounds = array<i64: 1, 2>, scalar_prefetch = 0 : i64, scratch_operands = 1 : i64, tpu.core_type = #tpu.core_type<tc>, window_params = [{transform_indices = @transform_0, window_bounds = array<i64: 128, 1>}, {pipeline_mode = #tpu.pipeline_mode<synchronous>, transform_indices = @transform_1, window_bounds = array<i64: 256, 128>}, {transform_indices = @transform_2, window_bounds = array<i64: 128, 128>}]} {
    %c0 = arith.constant 0 : index
    %c0_0 = arith.constant 0 : index
    %0 = vector.load %arg2[%c0, %c0_0] : memref<128x1xi32, #tpu.memory_space<vmem>>, vector<128x1xi32>
    %c128_i32 = arith.constant 128 : i32
    %1 = arith.muli %arg1, %c128_i32 : i32
    %2 = vector.broadcast %1 : i32 to vector<128x1xi32>
    %3 = arith.subi %0, %2 : vector<128x1xi32>
    %4 = tpu.iota {dimensions = array<i32: 1>} : vector<128x128xi32>
    %5 = vector.broadcast %3 : vector<128x1xi32> to vector<128x128xi32>
    %6 = arith.cmpi eq, %5, %4 : vector<128x128xi32>
    %7 = arith.extui %6 : vector<128x128xi1> to vector<128x128xi32>
    %8 = arith.sitofp %7 : vector<128x128xi32> to vector<128x128xf32>
    %c128_i32_1 = arith.constant 128 : i32
    %9 = arith.muli %arg1, %c128_i32_1 : i32
    %10 = tpu.assume_multiple %9, 128 : i32
    %11 = arith.index_cast %10 : i32 to index
    %c0_2 = arith.constant 0 : index
    %12 = vector.load %arg3[%11, %c0_2] : memref<256x128xf32, #tpu.memory_space<vmem>>, vector<128x128xf32>
    %cst = arith.constant dense<0.000000e+00> : vector<128x128xf32>
    %13 = tpu.matmul %8, %12, %cst {dimension_numbers = #tpu.dot_dimension_numbers<[1], [0], [0], [1], [0, 0, 1, 1], [], []>} : vector<128x128xf32>, vector<128x128xf32>, vector<128x128xf32> -> vector<128x128xf32>
    %c0_i32 = arith.constant 0 : i32
    %14 = arith.cmpi eq, %arg1, %c0_i32 : i32
    %15 = arith.extui %14 : i1 to i32
    %c0_i32_3 = arith.constant 0 : i32
    %16 = arith.cmpi ne, %15, %c0_i32_3 : i32
    scf.if %16 {
      %c0_7 = arith.constant 0 : index
      %c0_8 = arith.constant 0 : index
      %23 = vector.load %arg5[%c0_7, %c0_8] : memref<128x128xf32, #tpu.memory_space<vmem>>, vector<128x128xf32>
      tpu.vector_store %arg5[%c0_7, %c0_8], %13 {strides = array<i32>} : memref<128x128xf32, #tpu.memory_space<vmem>>, vector<128x128xf32>,
    } else {
    }
    %c0_i32_4 = arith.constant 0 : i32
    %17 = arith.cmpi ne, %arg1, %c0_i32_4 : i32
    %18 = arith.extui %17 : i1 to i32
    %c0_i32_5 = arith.constant 0 : i32
    %19 = arith.cmpi ne, %18, %c0_i32_5 : i32
    scf.if %19 {
      %c0_7 = arith.constant 0 : index
      %c0_8 = arith.constant 0 : index
      %23 = vector.load %arg5[%c0_7, %c0_8] : memref<128x128xf32, #tpu.memory_space<vmem>>, vector<128x128xf32>
      %24 = arith.addf %23, %13 : vector<128x128xf32>
      %c0_9 = arith.constant 0 : index
      %c0_10 = arith.constant 0 : index
      %25 = vector.load %arg5[%c0_9, %c0_10] : memref<128x128xf32, #tpu.memory_space<vmem>>, vector<128x128xf32>
      tpu.vector_store %arg5[%c0_9, %c0_10], %24 {strides = array<i32>} : memref<128x128xf32, #tpu.memory_space<vmem>>, vector<128x128xf32>,
    } else {
    }
    %c1_i32 = arith.constant 1 : i32
    %20 = arith.cmpi eq, %arg1, %c1_i32 : i32
    %21 = arith.extui %20 : i1 to i32
    %c0_i32_6 = arith.constant 0 : i32
    %22 = arith.cmpi ne, %21, %c0_i32_6 : i32
    scf.if %22 {
      %c0_7 = arith.constant 0 : index
      %c0_8 = arith.constant 0 : index
      %23 = vector.load %arg5[%c0_7, %c0_8] : memref<128x128xf32, #tpu.memory_space<vmem>>, vector<128x128xf32>
      %c0_9 = arith.constant 0 : index
      %c0_10 = arith.constant 0 : index
      %24 = vector.load %arg4[%c0_9, %c0_10] : memref<128x128xf32, #tpu.memory_space<vmem>>, vector<128x128xf32>
      tpu.vector_store %arg4[%c0_9, %c0_10], %23 {strides = array<i32>} : memref<128x128xf32, #tpu.memory_space<vmem>>, vector<128x128xf32>,
    } else {
    }
    return
  }
  func.func @transform_0(%arg0: i32, %arg1: i32) -> (i32, i32) {
    %c0_i32 = arith.constant 0 : i32
    %c0_i32_0 = arith.constant 0 : i32
    return %arg0, %c0_i32 : i32, i32
  }
  func.func @transform_1(%arg0: i32, %arg1: i32) -> (i32, i32) {
    %c0_i32 = arith.constant 0 : i32
    %c0_i32_0 = arith.constant 0 : i32
    %c0_i32_1 = arith.constant 0 : i32
    return %c0_i32, %c0_i32_0 : i32, i32
  }
  func.func @transform_2(%arg0: i32, %arg1: i32) -> (i32, i32) {
    %c0_i32 = arith.constant 0 : i32
    %c0_i32_0 = arith.constant 0 : i32
    return %arg0, %c0_i32 : i32, i32
  }
}

</mosaic_0001>

<bundles_post_ra>
// kernel: tpu_custom_call.1
= control target key start
LH: loop header
LB: loop body
LE: loop exit
PB: predicated region body
PF: predicated region fallthrough
CT: control target
= control target key end

     0   :  { %7 = vsyncpa [#allocation4], 0  ;;  %s1133_s0 = inlined_call_operand.vmem [shape: s32[128,1], index: 0, kind: input, shape index: {}]   ;;  %s1134_s1 = inlined_call_operand.hbm [shape: f32[256,128], index: 1, kind: input, shape index: {}]   ;;  %s1135_s2 = inlined_call_operand.hbm [shape: f32[128,128], index: 2, kind: output, shape index: {}]  }
   0x1   :  { %8 = vsyncpa [#allocation5], 0  ;;  %s967_s9 = smov 0   ;;  %s969_s10 = smov 0  }
   0x2   :  { %s971_s11 = smov 0  }
   0x3 LB: > { %s646_s12 = sadd.s32 4294967295, %s942_s11   ;;  %s23_s13 = sadd.s32 1, %s938_s10  ;;  %s942_s11 = sphi %s971_s11, %s14_s11   ;;  %s938_s10 = sphi %s969_s10, %s1140_s10   ;;  %s934_s9 = sphi %s967_s9, %s1139_s9  }
   0x4   : > { %p24_p0 = scmp.ge.s32.totalorder %s23_s13, 2  ;;  %p647_p1 = scmp.ge.s32.totalorder %s942_s11, 1 }
   0x5   : > { %p104_p2 = scmp.lt.s32.totalorder %s942_s11, 3  ;;  %p994_p4 = scmp.eq.s32.totalorder %s646_s12, 0 }
   0x6   : > { %s1142_s13 = smov (%p24_p0, %s23_s13), 0  ;;  %s944_s16 = smov [#allocation3]  }
   0x7   : > { %p988_p3 = pnand %p647_p1, %p104_p2  ;;  %s125_s17 = sshll.u32 %s944_s16, 4  ;;  %s126_s17 = int_to_ptr.vmem [resolvable:$true] %s125_s17 }
   0x8   : > { %s873_s18 = scalar_lea.vmem %s126_s17, 4096  ;;  %p881_p11 = scmp.lt.s32.totalorder %s126_s17, %s126_s17 }
   0x9   : > { %p820_p5 = pneg %p988_p3  ;;  %p874_p8 = scmp.ne.s32.totalorder %s126_s17, %s873_s18 }
   0xa   : > { %p882_p12 = scmp.lt.s32.totalorder %s873_s18, %s873_s18 }
   0xb   : > { %p821_p6 = pnand %p994_p4, %p820_p5 }
   0xc   : > { %p883_p13 = por %p882_p12, %p881_p11 }
   0xd   : > { %p864_p7 = pneg %p821_p6 }
   0xf   : > { %p876_p9 = pnand %p874_p8, %p864_p7 }
  0x11   : > { %p877_p10 = pneg %p876_p9 }
  0x13   : > { %p884_p0 = pnand %p883_p13, %p877_p10 }
  0x15   : > { %887 = shalt.err (!%p884_p0)
}
  0x16   : > { %s945_s19 = smov 128   ;;  %s946_s20 = smov 8  }
  0x17   : > { %823 = dma.hbm_to_vmem [thread:$0]  (!%p821_p6), %s1134_s1, 4096, %s126_s17, [#allocation4], %s945_s19, %s945_s19, %s946_s20  }
  0x18   : > { %141 = sbr.rel (%p988_p3) target bundleno = 440 (0x1b8), region = 28 }
  0x1d   : > { %925 = dma.done.wait (%p994_p4), [#allocation4], 4096  }
  0x1e   : > { %927 = vsyncadd (%p994_p4), [#allocation4], 4294963200  ;;  %v947_v0 = vmov 0   ;;  %s652_s23 = sshll.u32 %s934_s9, 7  ;;  %v166_v2 = vld [vmem:[%s1133_s0 + $0x8] sm:$0xff]  ;;  %v165_v3 = vld [vmem:[%s1133_s0] sm:$0xff]  ;;  %v199_v50 = vlaneseq }
  0x1f   : > { %861 = vset.pattern.permute.xlu1 %v947_v0  ;;  %860 = vset.pattern.permute.xlu0 %v947_v0  ;;  %v1012_v1 = vstv %s652_s23  ;;  %v174_v4 = vld [vmem:[%s1133_s0 + $0x48] sm:$0xff]  ;;  %v173_v7 = vld [vmem:[%s1133_s0 + $0x40] sm:$0xff]  ;;  %v175_v10 = vld [vmem:[%s1133_s0 + $0x50] sm:$0xff]  ;;  %s1036_s8 = scalar_lea.vmem [#allocation3], %s652_s23  ;;  %v948_v54 = vmov 1.0   ;;  %p685_p1 = scmp.ne.s32.totalorder %s934_s9, 0 }
  0x20   : > { %v184_v5 = vsub.s32 %v166_v2, %v1012_v1  ;;  %v183_v6 = vsub.s32 %v165_v3, %v1012_v1  ;;  %v192_v8 = vsub.s32 %v174_v4, %v1012_v1  ;;  %v191_v9 = vsub.s32 %v173_v7, %v1012_v1  ;;  %v167_v11 = vld [vmem:[%s1133_s0 + $0x10] sm:$0xff]  ;;  %v313_v12 = vld [vmem:[%s1036_s8 + $0x78] sm:$0xff]  ;;  %v311_v18 = vld [vmem:[%s1036_s8 + $0x68] sm:$0xff] }
  0x21   : > { %724 = vmatprep.subr.mxu0 %v313_v12  ;;  %v312_v13 = vld [vmem:[%s1036_s8 + $0x70] sm:$0xff]  ;;  %780 = vmatprep.subr.mxu1 %v313_v12  ;;  %v193_v14 = vsub.s32 %v175_v10, %v1012_v1  ;;  %v185_v15 = vsub.s32 %v167_v11, %v1012_v1  ;;  %v176_v16 = vld [vmem:[%s1133_s0 + $0x58] sm:$0xff]  ;;  %v310_v21 = vld [vmem:[%s1036_s8 + $0x60] sm:$0xff]  ;;  %v200_v51 = vand.u32 127, %v199_v50 }
  0x22   : > { %205 = vperm.xlu1 %861, %v184_v5   ;;  %202 = vperm.xlu0 %860, %v183_v6   ;;  %v168_v17 = vld [vmem:[%s1133_s0 + $0x18] sm:$0xff]  ;;  %v194_v19 = vsub.s32 %v176_v16, %v1012_v1  ;;  %v177_v22 = vld [vmem:[%s1133_s0 + $0x60] sm:$0xff]  ;;  %v178_v27 = vld [vmem:[%s1133_s0 + $0x68] sm:$0xff] }
  0x23   : > { %725 = vmatpush3.msra.mxu0 %v313_v12  ;;  %796 = vmatpush3.msra.mxu1 %v313_v12  ;;  %v186_v20 = vsub.s32 %v168_v17, %v1012_v1  ;;  %v169_v23 = vld [vmem:[%s1133_s0 + $0x20] sm:$0xff]  ;;  %v309_v24 = vld [vmem:[%s1036_s8 + $0x58] sm:$0xff]  ;;  %v195_v25 = vsub.s32 %v177_v22, %v1012_v1  ;;  %v170_v28 = vld [vmem:[%s1133_s0 + $0x28] sm:$0xff]  ;;  %v196_v30 = vsub.s32 %v178_v27, %v1012_v1 }
  0x24   : > { %726 = vmatprep.subr.mxu0 %v312_v13  ;;  %781 = vmatprep.subr.mxu1 %v312_v13  ;;  %v187_v26 = vsub.s32 %v169_v23, %v1012_v1  ;;  %v308_v29 = vld [vmem:[%s1036_s8 + $0x50] sm:$0xff]  ;;  %v188_v31 = vsub.s32 %v170_v28, %v1012_v1  ;;  %v307_v32 = vld [vmem:[%s1036_s8 + $0x48] sm:$0xff]  ;;  %v306_v35 = vld [vmem:[%s1036_s8 + $0x40] sm:$0xff] }
  0x25   : > { %727 = vmatpush3.msra.mxu0 %v312_v13  ;;  %797 = vmatpush3.msra.mxu1 %v312_v13  ;;  %v179_v33 = vld [vmem:[%s1133_s0 + $0x70] sm:$0xff]  ;;  %v180_v38 = vld [vmem:[%s1133_s0 + $0x78] sm:$0xff]  ;;  %v303_v44 = vld [vmem:[%s1036_s8 + $0x28] sm:$0xff] }
  0x26   : > { %229 = vperm.xlu1 %861, %v192_v8   ;;  %226 = vperm.xlu0 %860, %v191_v9   ;;  %v171_v34 = vld [vmem:[%s1133_s0 + $0x30] sm:$0xff]  ;;  %v197_v36 = vsub.s32 %v179_v33, %v1012_v1  ;;  %v172_v39 = vld [vmem:[%s1133_s0 + $0x38] sm:$0xff]  ;;  %v198_v41 = vsub.s32 %v180_v38, %v1012_v1  ;;  %v302_v45 = vld [vmem:[%s1036_s8 + $0x20] sm:$0xff] }
  0x27   : > { %728 = vmatprep.subr.mxu0 %v311_v18  ;;  %782 = vmatprep.subr.mxu1 %v311_v18  ;;  %v189_v37 = vsub.s32 %v171_v34, %v1012_v1  ;;  %v305_v40 = vld [vmem:[%s1036_s8 + $0x38] sm:$0xff]  ;;  %v190_v42 = vsub.s32 %v172_v39, %v1012_v1  ;;  %v304_v43 = vld [vmem:[%s1036_s8 + $0x30] sm:$0xff]  ;;  %v299_v48 = vld [vmem:[%s1036_s8 + $0x8] sm:$0xff] }
  0x28   : > { %729 = vmatpush3.msra.mxu0 %v311_v18  ;;  %798 = vmatpush3.msra.mxu1 %v311_v18  ;;  %v301_v46 = vld [vmem:[%s1036_s8 + $0x18] sm:$0xff]  ;;  %v300_v47 = vld [vmem:[%s1036_s8 + $0x10] sm:$0xff]  ;;  %v298_v49 = vld [vmem:[%s1036_s8] sm:$0xff] }
  0x29   : > { %730 = vmatprep.subr.mxu0 %v310_v21  ;;  %783 = vmatprep.subr.mxu1 %v310_v21 }
  0x2a   : > { %232 = vperm.xlu1 %861, %v193_v14   ;;  %208 = vperm.xlu0 %860, %v185_v15  }
  0x2b   : > { %731 = vmatpush3.msra.mxu0 %v310_v21  ;;  %799 = vmatpush3.msra.mxu1 %v310_v21 }
  0x2c   : > { %732 = vmatprep.subr.mxu0 %v309_v24  ;;  %784 = vmatprep.subr.mxu1 %v309_v24 }
  0x2d   : > { %733 = vmatpush3.msra.mxu0 %v309_v24  ;;  %800 = vmatpush3.msra.mxu1 %v309_v24 }
  0x2e   : > { %235 = vperm.xlu1 %861, %v194_v19   ;;  %211 = vperm.xlu0 %860, %v186_v20  }
  0x2f   : > { %734 = vmatprep.subr.mxu0 %v308_v29  ;;  %785 = vmatprep.subr.mxu1 %v308_v29 }
  0x30   : > { %735 = vmatpush3.msra.mxu0 %v308_v29  ;;  %801 = vmatpush3.msra.mxu1 %v308_v29 }
  0x31   : > { %736 = vmatprep.subr.mxu0 %v307_v32  ;;  %786 = vmatprep.subr.mxu1 %v307_v32 }
  0x32   : > { %238 = vperm.xlu1 %861, %v195_v25   ;;  %214 = vperm.xlu0 %860, %v187_v26  }
  0x33   : > { %737 = vmatpush3.msra.mxu0 %v307_v32  ;;  %802 = vmatpush3.msra.mxu1 %v307_v32 }
  0x34   : > { %738 = vmatprep.subr.mxu0 %v306_v35  ;;  %787 = vmatprep.subr.mxu1 %v306_v35 }
  0x35   : > { %739 = vmatpush3.msra.mxu0 %v306_v35  ;;  %803 = vmatpush3.msra.mxu1 %v306_v35 }
  0x36   : > { %241 = vperm.xlu1 %861, %v196_v30   ;;  %217 = vperm.xlu0 %860, %v188_v31  }
  0x37   : > { %740 = vmatprep.subr.mxu0 %v305_v40  ;;  %788 = vmatprep.subr.mxu1 %v305_v40 }
  0x38   : > { %741 = vmatpush3.msra.mxu0 %v305_v40  ;;  %804 = vmatpush3.msra.mxu1 %v305_v40 }
  0x39   : > { %742 = vmatprep.subr.mxu0 %v304_v43  ;;  %789 = vmatprep.subr.mxu1 %v304_v43 }
  0x3a   : > { %244 = vperm.xlu1 %861, %v197_v36   ;;  %220 = vperm.xlu0 %860, %v189_v37  }
  0x3b   : > { %743 = vmatpush3.msra.mxu0 %v304_v43  ;;  %805 = vmatpush3.msra.mxu1 %v304_v43 }
  0x3c   : > { %744 = vmatprep.subr.mxu0 %v303_v44  ;;  %790 = vmatprep.subr.mxu1 %v303_v44 }
  0x3d   : > { %745 = vmatpush3.msra.mxu0 %v303_v44  ;;  %806 = vmatpush3.msra.mxu1 %v303_v44 }
  0x3e   : > { %247 = vperm.xlu1 %861, %v198_v41   ;;  %223 = vperm.xlu0 %860, %v190_v42  }
  0x3f   : > { %746 = vmatprep.subr.mxu0 %v302_v45  ;;  %791 = vmatprep.subr.mxu1 %v302_v45 }
  0x40   : > { %747 = vmatpush3.msra.mxu0 %v302_v45  ;;  %807 = vmatpush3.msra.mxu1 %v302_v45 }
  0x41   : > { %748 = vmatprep.subr.mxu0 %v301_v46  ;;  %792 = vmatprep.subr.mxu1 %v301_v46 }
  0x42   : > { %749 = vmatpush3.msra.mxu0 %v301_v46  ;;  %808 = vmatpush3.msra.mxu1 %v301_v46 }
  0x43   : > { %750 = vmatprep.subr.mxu0 %v300_v47  ;;  %793 = vmatprep.subr.mxu1 %v300_v47 }
  0x44   : > { %751 = vmatpush3.msra.mxu0 %v300_v47  ;;  %809 = vmatpush3.msra.mxu1 %v300_v47 }
  0x45   : > { %752 = vmatprep.subr.mxu0 %v299_v48  ;;  %794 = vmatprep.subr.mxu1 %v299_v48 }
  0x46   : > { %753 = vmatpush3.msra.mxu0 %v299_v48  ;;  %810 = vmatpush3.msra.mxu1 %v299_v48 }
  0x47   : > { %754 = vmatprep.subr.mxu0 %v298_v49  ;;  %795 = vmatprep.subr.mxu1 %v298_v49 }
  0x48   : > { %755 = vmatpush3.msra.mxu0 %v298_v49  ;;  %811 = vmatpush3.msra.mxu1 %v298_v49 }
  0x9d   : > { %v206_v52 = vpop.permute.xlu1 %205  ;;  %v203_v53 = vpop.permute.xlu0 %202 }
  0x9e   : > { %vm250_vm0 = vcmp.eq.s32.totalorder %v206_v52, %v200_v51  ;;  %vm249_vm1 = vcmp.eq.s32.totalorder %v203_v53, %v200_v51 }
  0x9f   : > { %756 = vmatprep.mubr.msk.f32.mxu0 %vm249_vm1, %v948_v54 }
  0xa0   : > { %757 = vmatmul.mubr.msk.f32.vlgmr.msra.gmra.mxu0 %vm250_vm0, %v948_v54 }
  0xa1   : > { %v230_v55 = vpop.permute.xlu1 %229  ;;  %v227_v56 = vpop.permute.xlu0 %226 }
  0xa2   : > { %vm258_vm2 = vcmp.eq.s32.totalorder %v230_v55, %v200_v51  ;;  %vm257_vm3 = vcmp.eq.s32.totalorder %v227_v56, %v200_v51 }
  0xa3   : > { %768 = vmatprep.mubr.msk.f32.mxu1 %vm257_vm3, %v948_v54 }
  0xa4   : > { %769 = vmatmul.mubr.msk.f32.vlgmr.msra.gmra.mxu1 %vm258_vm2, %v948_v54 }
  0xa5   : > { %v233_v57 = vpop.permute.xlu1 %232  ;;  %v209_v58 = vpop.permute.xlu0 %208 }
  0xa6   : > { %vm259_vm4 = vcmp.eq.s32.totalorder %v233_v57, %v200_v51  ;;  %vm251_vm5 = vcmp.eq.s32.totalorder %v209_v58, %v200_v51 }
  0xa7   : > { %759 = vmatprep.mubr.msk.f32.mxu0 %vm251_vm5, %v948_v54  ;;  %771 = vmatprep.mubr.msk.f32.mxu1 %vm259_vm4, %v948_v54 }
  0xa9   : > { %v236_v59 = vpop.permute.xlu1 %235  ;;  %v212_v60 = vpop.permute.xlu0 %211 }
  0xaa   : > { %vm260_vm6 = vcmp.eq.s32.totalorder %v236_v59, %v200_v51  ;;  %vm252_vm7 = vcmp.eq.s32.totalorder %v212_v60, %v200_v51 }
  0xab   : > { %760 = vmatmul.mubr.msk.f32.gmra.mxu0 %vm252_vm7, %v948_v54  ;;  %772 = vmatmul.mubr.msk.f32.gmra.mxu1 %vm260_vm6, %v948_v54 }
  0xad   : > { %v239_v61 = vpop.permute.xlu1 %238  ;;  %v215_v62 = vpop.permute.xlu0 %214 }
  0xae   : > { %vm261_vm8 = vcmp.eq.s32.totalorder %v239_v61, %v200_v51  ;;  %vm253_vm9 = vcmp.eq.s32.totalorder %v215_v62, %v200_v51 }
  0xaf   : > { %762 = vmatprep.mubr.msk.f32.mxu0 %vm253_vm9, %v948_v54  ;;  %774 = vmatprep.mubr.msk.f32.mxu1 %vm261_vm8, %v948_v54 }
  0xb1   : > { %v242_v63 = vpop.permute.xlu1 %241  ;;  %v218_v0 = vpop.permute.xlu0 %217 }
  0xb2   : > { %vm262_vm10 = vcmp.eq.s32.totalorder %v242_v63, %v200_v51  ;;  %vm254_vm11 = vcmp.eq.s32.totalorder %v218_v0, %v200_v51 }
  0xb3   : > { %763 = vmatmul.mubr.msk.f32.gmra.mxu0 %vm254_vm11, %v948_v54  ;;  %775 = vmatmul.mubr.msk.f32.gmra.mxu1 %vm262_vm10, %v948_v54 }
  0xb5   : > { %v245_v1 = vpop.permute.xlu1 %244  ;;  %v221_v2 = vpop.permute.xlu0 %220 }
  0xb6   : > { %vm263_vm12 = vcmp.eq.s32.totalorder %v245_v1, %v200_v51  ;;  %vm255_vm13 = vcmp.eq.s32.totalorder %v221_v2, %v200_v51 }
  0xb7   : > { %765 = vmatprep.mubr.msk.f32.mxu0 %vm255_vm13, %v948_v54  ;;  %777 = vmatprep.mubr.msk.f32.mxu1 %vm263_vm12, %v948_v54 }
  0xb9   : > { %v248_v3 = vpop.permute.xlu1 %247  ;;  %v224_v4 = vpop.permute.xlu0 %223 }
  0xba   : > { %vm264_vm14 = vcmp.eq.s32.totalorder %v248_v3, %v200_v51  ;;  %vm256_vm15 = vcmp.eq.s32.totalorder %v224_v4, %v200_v51 }
  0xbb   : > { %766 = vmatmul.mubr.msk.f32.gmra.mxu0 %vm256_vm15, %v948_v54  ;;  %778 = vmatmul.mubr.msk.f32.gmra.mxu1 %vm264_vm14, %v948_v54 }
 0x160   : > { %v758_v5 = vpop.f32.mrf.mxu0 }
 0x162   : > { %v380_v6 = vpop.f32.mrf.mxu0 }
 0x164   : > { %v770_v7 = vpop.f32.mrf.mxu1 }
 0x166   : > { %v420_v8 = vpop.f32.mrf.mxu1 }
 0x16b   : > { %v761_v9 = vpop.f32.mrf.mxu0  ;;  %v773_v10 = vpop.f32.mrf.mxu1 }
 0x16d   : > { %v390_v11 = vpop.f32.mrf.mxu0  ;;  %v430_v12 = vpop.f32.mrf.mxu1 }
 0x173   : > { %v764_v13 = vpop.f32.mrf.mxu0  ;;  %v1096_v14 = vpop.f32.mrf.mxu1 }
 0x175   : > { %v400_v15 = vpop.f32.mrf.mxu0  ;;  %v440_v16 = vpop.f32.mrf.mxu1 }
 0x179   : > { %462 = sbr.rel (%p685_p1) target bundleno = 390 (0x186), region = 36 }
 0x17b   : > { %v767_v17 = vpop.f32.mrf.mxu0  ;;  %v1098_v18 = vpop.f32.mrf.mxu1 }
 0x17d   : > { %v410_v19 = vpop.f32.mrf.mxu0  ;;  %v450_v20 = vpop.f32.mrf.mxu1 }
 0x17e   : > { %463 = vst [vmem:[#allocation2 + $0x30] sm:$0xff] %v380_v6  ;;  %464 = vst [vmem:[#allocation2] sm:$0xff] %v758_v5 }
 0x17f   : > { %465 = vst [vmem:[#allocation2 + $0x58] sm:$0xff] %v390_v11  ;;  %466 = vst [vmem:[#allocation2 + $0x18] sm:$0xff] %v761_v9 }
 0x180   : > { %467 = vst [vmem:[#allocation2 + $0x50] sm:$0xff] %v400_v15  ;;  %468 = vst [vmem:[#allocation2 + $0x68] sm:$0xff] %v764_v13 }
 0x181   : > { %469 = vst [vmem:[#allocation2 + $0x8] sm:$0xff] %v410_v19  ;;  %470 = vst [vmem:[#allocation2 + $0x48] sm:$0xff] %v767_v17 }
 0x182   : > { %471 = vst [vmem:[#allocation2 + $0x40] sm:$0xff] %v420_v8  ;;  %472 = vst [vmem:[#allocation2 + $0x20] sm:$0xff] %v770_v7 }
 0x183   : > { %473 = vst [vmem:[#allocation2 + $0x10] sm:$0xff] %v430_v12  ;;  %474 = vst [vmem:[#allocation2 + $0x38] sm:$0xff] %v773_v10 }
 0x184   : > { %475 = vst [vmem:[#allocation2 + $0x60] sm:$0xff] %v440_v16  ;;  %476 = vst [vmem:[#allocation2 + $0x70] sm:$0xff] %v1096_v14 }
 0x185   : > { %477 = vst [vmem:[#allocation2 + $0x78] sm:$0xff] %v450_v20  ;;  %478 = vst [vmem:[#allocation2 + $0x28] sm:$0xff] %v1098_v18 }
 0x186 PF: > { %p686_p2 = scmp.eq.s32.totalorder %s934_s9, 0 }
 0x188   : > { %482 = sbr.rel (%p686_p2) target bundleno = 408 (0x198), region = 40 }
 0x18d   : > { %v483_v21 = vld [vmem:[#allocation2 + $0x30] sm:$0xff]  ;;  %v484_v22 = vld [vmem:[#allocation2] sm:$0xff]  ;;  %v485_v23 = vld [vmem:[#allocation2 + $0x58] sm:$0xff] }
 0x18e   : > { %v499_v24 = vadd.f32 %v483_v21, %v380_v6  ;;  %v500_v25 = vadd.f32 %v758_v5, %v484_v22  ;;  %v501_v26 = vadd.f32 %v485_v23, %v390_v11  ;;  %v486_v27 = vld [vmem:[#allocation2 + $0x18] sm:$0xff]  ;;  %v487_v28 = vld [vmem:[#allocation2 + $0x50] sm:$0xff]  ;;  %v488_v29 = vld [vmem:[#allocation2 + $0x68] sm:$0xff] }
 0x18f   : > { %v502_v30 = vadd.f32 %v761_v9, %v486_v27  ;;  %v503_v31 = vadd.f32 %v487_v28, %v400_v15  ;;  %v504_v32 = vadd.f32 %v764_v13, %v488_v29  ;;  %v489_v33 = vld [vmem:[#allocation2 + $0x8] sm:$0xff]  ;;  %v491_v35 = vld [vmem:[#allocation2 + $0x40] sm:$0xff]  ;;  %v493_v40 = vld [vmem:[#allocation2 + $0x10] sm:$0xff] }
 0x190   : > { %v490_v34 = vld [vmem:[#allocation2 + $0x48] sm:$0xff]  ;;  %515 = vst [vmem:[#allocation2 + $0x30] sm:$0xff] %v499_v24  ;;  %516 = vst [vmem:[#allocation2] sm:$0xff] %v500_v25  ;;  %v505_v36 = vadd.f32 %v489_v33, %v410_v19  ;;  %v507_v38 = vadd.f32 %v491_v35, %v420_v8  ;;  %v492_v39 = vld [vmem:[#allocation2 + $0x20] sm:$0xff]  ;;  %v509_v43 = vadd.f32 %v493_v40, %v430_v12 }
 0x191   : > { %517 = vst [vmem:[#allocation2 + $0x58] sm:$0xff] %v501_v26  ;;  %v506_v37 = vadd.f32 %v767_v17, %v490_v34  ;;  %v494_v41 = vld [vmem:[#allocation2 + $0x38] sm:$0xff]  ;;  %518 = vst [vmem:[#allocation2 + $0x18] sm:$0xff] %v502_v30  ;;  %v508_v42 = vadd.f32 %v770_v7, %v492_v39  ;;  %v495_v45 = vld [vmem:[#allocation2 + $0x60] sm:$0xff] }
 0x192   : > { %519 = vst [vmem:[#allocation2 + $0x50] sm:$0xff] %v503_v31  ;;  %520 = vst [vmem:[#allocation2 + $0x68] sm:$0xff] %v504_v32  ;;  %v510_v44 = vadd.f32 %v773_v10, %v494_v41  ;;  %v496_v46 = vld [vmem:[#allocation2 + $0x70] sm:$0xff]  ;;  %v497_v47 = vld [vmem:[#allocation2 + $0x78] sm:$0xff]  ;;  %v511_v48 = vadd.f32 %v495_v45, %v440_v16 }
 0x193   : > { %521 = vst [vmem:[#allocation2 + $0x8] sm:$0xff] %v505_v36  ;;  %522 = vst [vmem:[#allocation2 + $0x48] sm:$0xff] %v506_v37  ;;  %v512_v49 = vadd.f32 %v1096_v14, %v496_v46  ;;  %v513_v50 = vadd.f32 %v497_v47, %v450_v20  ;;  %v498_v51 = vld [vmem:[#allocation2 + $0x28] sm:$0xff] }
 0x194   : > { %523 = vst [vmem:[#allocation2 + $0x40] sm:$0xff] %v507_v38  ;;  %524 = vst [vmem:[#allocation2 + $0x20] sm:$0xff] %v508_v42  ;;  %v514_v52 = vadd.f32 %v1098_v18, %v498_v51 }
 0x195   : > { %525 = vst [vmem:[#allocation2 + $0x10] sm:$0xff] %v509_v43  ;;  %526 = vst [vmem:[#allocation2 + $0x38] sm:$0xff] %v510_v44 }
 0x196   : > { %527 = vst [vmem:[#allocation2 + $0x60] sm:$0xff] %v511_v48  ;;  %528 = vst [vmem:[#allocation2 + $0x70] sm:$0xff] %v512_v49 }
 0x197   : > { %529 = vst [vmem:[#allocation2 + $0x78] sm:$0xff] %v513_v50  ;;  %530 = vst [vmem:[#allocation2 + $0x28] sm:$0xff] %v514_v52 }
 0x198 PF: > { %p687_p3 = scmp.ne.s32.totalorder %s934_s9, 1 }
 0x19a   : > { %534 = sbr.rel (%p687_p3) target bundleno = 424 (0x1a8), region = 44 }
 0x19f   : > { %v535_v53 = vld [vmem:[#allocation2 + $0x30] sm:$0xff]  ;;  %v536_v54 = vld [vmem:[#allocation2] sm:$0xff]  ;;  %v537_v55 = vld [vmem:[#allocation2 + $0x58] sm:$0xff] }
 0x1a0   : > { %551 = vst [vmem:[#allocation6] sm:$0xff] %v535_v53  ;;  %552 = vst [vmem:[#allocation6 + $0x8] sm:$0xff] %v536_v54  ;;  %v538_v56 = vld [vmem:[#allocation2 + $0x18] sm:$0xff]  ;;  %v539_v57 = vld [vmem:[#allocation2 + $0x50] sm:$0xff] }
 0x1a1   : > { %553 = vst [vmem:[#allocation6 + $0x10] sm:$0xff] %v537_v55  ;;  %v540_v58 = vld [vmem:[#allocation2 + $0x68] sm:$0xff]  ;;  %554 = vst [vmem:[#allocation6 + $0x18] sm:$0xff] %v538_v56  ;;  %v543_v61 = vld [vmem:[#allocation2 + $0x40] sm:$0xff] }
 0x1a2   : > { %555 = vst [vmem:[#allocation6 + $0x20] sm:$0xff] %v539_v57  ;;  %556 = vst [vmem:[#allocation6 + $0x28] sm:$0xff] %v540_v58  ;;  %v541_v59 = vld [vmem:[#allocation2 + $0x8] sm:$0xff]  ;;  %v544_v62 = vld [vmem:[#allocation2 + $0x20] sm:$0xff] }
 0x1a3   : > { %v542_v60 = vld [vmem:[#allocation2 + $0x48] sm:$0xff]  ;;  %557 = vst [vmem:[#allocation6 + $0x30] sm:$0xff] %v541_v59  ;;  %559 = vst [vmem:[#allocation6 + $0x40] sm:$0xff] %v543_v61  ;;  %v545_v63 = vld [vmem:[#allocation2 + $0x10] sm:$0xff] }
 0x1a4   : > { %558 = vst [vmem:[#allocation6 + $0x38] sm:$0xff] %v542_v60  ;;  %v546_v0 = vld [vmem:[#allocation2 + $0x38] sm:$0xff]  ;;  %560 = vst [vmem:[#allocation6 + $0x48] sm:$0xff] %v544_v62  ;;  %v547_v1 = vld [vmem:[#allocation2 + $0x60] sm:$0xff] }
 0x1a5   : > { %561 = vst [vmem:[#allocation6 + $0x50] sm:$0xff] %v545_v63  ;;  %562 = vst [vmem:[#allocation6 + $0x58] sm:$0xff] %v546_v0  ;;  %v548_v2 = vld [vmem:[#allocation2 + $0x70] sm:$0xff]  ;;  %v549_v3 = vld [vmem:[#allocation2 + $0x78] sm:$0xff] }
 0x1a6   : > { %563 = vst [vmem:[#allocation6 + $0x60] sm:$0xff] %v547_v1  ;;  %564 = vst [vmem:[#allocation6 + $0x68] sm:$0xff] %v548_v2  ;;  %v550_v4 = vld [vmem:[#allocation2 + $0x28] sm:$0xff] }
 0x1a7   : > { %565 = vst [vmem:[#allocation6 + $0x70] sm:$0xff] %v549_v3  ;;  %566 = vst [vmem:[#allocation6 + $0x78] sm:$0xff] %v550_v4 }
 0x1a8 PF: > { %p1109_p4 = scmp.eq.s32.totalorder %s646_s12, 1  ;;  %s949_s6 = smov [#allocation6]  }
 0x1a9   : > { %s576_s7 = sshll.u32 %s949_s6, 4  ;;  %s577_s7 = int_to_ptr.vmem [resolvable:$true] %s576_s7 }
 0x1aa   : > { %s888_s8 = scalar_lea.vmem %s577_s7, 2048  ;;  %p895_p8 = scmp.lt.s32.totalorder %s577_s7, %s577_s7 }
 0x1ab   : > { %p889_p5 = scmp.ne.s32.totalorder %s577_s7, %s888_s8  ;;  %p896_p9 = scmp.lt.s32.totalorder %s888_s8, %s888_s8 }
 0x1ad   : > { %p890_p6 = pnand %p889_p5, %p1109_p4  ;;  %p897_p10 = por %p896_p9, %p895_p8 }
 0x1af   : > { %p891_p7 = pneg %p890_p6 }
 0x1b1   : > { %p898_p11 = pnand %p897_p10, %p891_p7 }
 0x1b3   : > { %901 = shalt.err (!%p898_p11)
}
 0x1b4   : > { %s950_s14 = smov 128   ;;  %s951_s12 = smov 8  }
 0x1b5   : > { %817 = dma.vmem_to_hbm [thread:$0]  (%p1109_p4), %s577_s7, 2048, %s1135_s2, [#allocation5], %s950_s14, %s950_s14, %s951_s12  }
 0x1b6   : > { %929 = dma.done.wait (%p1109_p4), [#allocation5], 2048  }
 0x1b7   : > { %931 = vsyncadd (%p1109_p4), [#allocation5], 4294965248 }
 0x1b8 PF: > { %s14_s11 = sadd.s32 1, %s942_s11   ;;  %s1139_s9 = smov %s938_s10 }
 0x1b9   : > { %p11_p12 = scmp.ge.s32.totalorder %s14_s11, 4   ;;  %s1140_s10 = smov %s1142_s13 }
 0x1bb   :  { %13 = sbr.rel (!%p11_p12) target bundleno = 3 (0x3), region = 74 }
 0x1c0   :  { %592 = vsyncpa [#allocation4], 1 }
 0x1c1   :  { %594 = vsyncpa [#allocation4 + $0x1], 1 }
 0x1c2   :  { %595 = vsyncpa [#allocation5], 1 }
 0x1c3   :  { %597 = vsyncpa [#allocation5 + $0x1], 1 }

</bundles_post_ra>
